<compile_context>
chip_gen: v7x
topology: tpu7x:2x2x1
jax: 0.10.0
libtpu: 0.0.40
codegen_flags: <defaults>
</compile_context>

<pallas_src>
import jax
import jax.numpy as jnp
from jax.experimental import pallas as pl
from jax.experimental.pallas import tpu as pltpu

_EPS = 1e-12                 # torch.nn.functional.normalize default eps
_EPS_SQ = _EPS * _EPS        # rsqrt(max(ssq, eps^2)) == 1 / max(sqrt(ssq), eps)
_LANE = 128
_BK_CAP = 2048               # K-tile cap: bounds x/w tile bytes for any F_in


def _round_up(v, m):
    return -(-v // m) * m


def _round_down(v, m):
    return (v // m) * m


def _angular_linear_kernel(inv_xn_ref, x_ref, w_ref, o_ref, acc_ref, wssq_ref):
    k = pl.program_id(2)

    @pl.when(k == 0)
    def _init():
        acc_ref[...] = jnp.zeros_like(acc_ref)
        wssq_ref[...] = jnp.zeros_like(wssq_ref)

    x = x_ref[...]                       # (BM, BK) native dtype
    w = w_ref[...]                       # (BN, BK) native dtype

    # Raw cosine numerator on the MXU: x @ w.T with f32 accumulation.
    acc_ref[...] += jax.lax.dot_general(
        x, w,
        dimension_numbers=(((1,), (1,)), ((), ())),
        preferred_element_type=jnp.float32,
    )

    # Per-output-row ||w||^2 partial sums from the already-resident weight
    # tile.  ones(1,BK) contracted with (w*w)(BN,BK) yields the (1, BN) lane
    # layout needed for column scaling -- no transposes / 1-D reshapes.
    wf = w.astype(jnp.float32)
    ones_row = jnp.ones((1, wf.shape[1]), jnp.float32)
    wssq_ref[...] += jax.lax.dot_general(
        ones_row, wf * wf,
        dimension_numbers=(((1,), (1,)), ((), ())),
        preferred_element_type=jnp.float32,
    )

    @pl.when(k == pl.num_programs(2) - 1)
    def _finalize():
        inv_wn = jax.lax.rsqrt(jnp.maximum(wssq_ref[...], _EPS_SQ))   # (1, BN)
        cos = acc_ref[...] * inv_xn_ref[...] * inv_wn                 # (BM, BN)
        o_ref[...] = jnp.clip(cos, -1.0, 1.0).astype(o_ref.dtype)


def _vmem_budget_bytes():
    """~3/4 of physical VMEM; falls back to a v7x-safe 48 MiB."""
    cap = None
    try:
        cap = getattr(pltpu.get_tpu_info(), "vmem_capacity_bytes", None)
    except Exception:
        cap = None
    if not cap:
        return 48 * 1024 * 1024
    return min(int(cap) * 3 // 4, 100 * 1024 * 1024)


def _choose_tiles(b, f_in, f_out, x_isize, w_isize, o_isize, budget,
                  block_m, block_n, block_k):
    # BM: whole (usually small) batch; cap at 512 for huge batches.
    bm = min(block_m, b) if block_m is not None else (b if b <= 512 else 512)

    # BK: whole F_in when modest, else a 2048-wide K tile (F_in zero-padded in
    # the wrapper if ragged) so tile bytes stay bounded for any F_in.
    bk = min(block_k, f_in) if block_k is not None else min(f_in, _BK_CAP)

    if block_n is not None:
        return bm, min(block_n, f_out), bk

    # BN: as wide as the VMEM budget allows (fewer grid steps, bigger weight
    # DMAs, lane-dense unmasked stores), rounded to a multiple of 256.
    fixed = 2 * bm * bk * x_isize          # double-buffered x tiles
    fixed += 2 * bm * _LANE * 4            # (BM, 1) inv_x blocks (lane padded)
    per_bn = 2 * bk * w_isize + 2 * bm * o_isize + bm * 4 + 32
    avail = max(budget - fixed, per_bn * _LANE)
    bn = min(max(avail // per_bn, _LANE), 4096)
    if bn >= f_out:
        bn = f_out
        # v7x megacore: a 1x1 (i, j) grid leaves one TensorCore idle; split
        # F_out into >= 2 "parallel" blocks when it is wide enough.
        if b <= bm and f_out >= 2 * _LANE:
            bn = _round_up(-(-f_out // 2), _LANE)
    else:
        bn = _round_down(bn, 256) or _round_down(bn, _LANE) or _LANE
    return bm, bn, bk


def angular_linear(x, weight, *, block_m=None, block_n=None, block_k=None):
    """Pallas implementation of AnglularLinear.forward.

    Args:
      x:      (B, ...) input; flattened to (B, F_in) like x.view(B, -1).
      weight: (F_out, F_in) parameter.
      block_m/n/k: optional tile-size overrides.
    Returns:
      (B, F_out) cosine logits in x.dtype, clamped to [-1, 1].
    """
    b = x.shape[0]
    x2 = x.reshape(b, -1)
    f_out, f_in = weight.shape
    if x2.shape[1] != f_in:
        raise ValueError("flattened input features must match weight")

    # Hoisted per-row 1/||x||: tiny (B, 1) f32 side input, computed once per
    # call instead of once per (j, k) tile inside the kernel.
    xf = x2.astype(jnp.float32)
    inv_xn = jax.lax.rsqrt(
        jnp.maximum(jnp.sum(xf * xf, axis=1, keepdims=True), _EPS_SQ))

    budget = _vmem_budget_bytes()
    bm, bn, bk = _choose_tiles(
        b, f_in, f_out,
        jnp.dtype(x2.dtype).itemsize, jnp.dtype(weight.dtype).itemsize,
        jnp.dtype(x2.dtype).itemsize, budget, block_m, block_n, block_k)

    # The K axis must never be ragged (padding garbage would corrupt valid
    # outputs): zero-pad F_in up to a BK multiple when needed.
    n_k = -(-f_in // bk)
    f_in_p = n_k * bk
    if f_in_p != f_in:
        x2 = jnp.pad(x2, ((0, 0), (0, f_in_p - f_in)))
        weight = jnp.pad(weight, ((0, 0), (0, f_in_p - f_in)))

    grid = (pl.cdiv(b, bm), pl.cdiv(f_out, bn), n_k)

    return pl.pallas_call(
        _angular_linear_kernel,
        out_shape=jax.ShapeDtypeStruct((b, f_out), x.dtype),
        grid=grid,
        in_specs=[
            pl.BlockSpec((bm, 1), lambda i, j, k: (i, 0)),     # 1/||x_row||
            pl.BlockSpec((bm, bk), lambda i, j, k: (i, k)),    # x rows
            pl.BlockSpec((bn, bk), lambda i, j, k: (j, k)),    # weight rows
        ],
        out_specs=pl.BlockSpec((bm, bn), lambda i, j, k: (i, j)),
        scratch_shapes=[
            pltpu.VMEM((bm, bn), jnp.float32),    # f32 matmul accumulator
            pltpu.VMEM((1, bn), jnp.float32),     # sum_k ||w_row||^2 partials
        ],
        compiler_params=pltpu.CompilerParams(
            dimension_semantics=("parallel", "parallel", "arbitrary"),
            vmem_limit_bytes=budget,
        ),
    )(inv_xn, x2, weight)


def init_angular_weight(key, in_features, out_features):
    """Deterministic equivalent of:
       weight.data.normal_().renorm_(2, 0, 1e-05).mul_(100000.0)
    """
    w = jax.random.normal(key, (out_features, in_features), dtype=jnp.float32)
    row_norm = jnp.sqrt(jnp.sum(w * w, axis=-1, keepdims=True))
    maxnorm = 1e-05
    scale = jnp.where(row_norm > maxnorm, maxnorm / (row_norm + 1e-7), 1.0)
    return w * scale * 100000.0


def _reference(x, weight):
    xf = x.reshape(x.shape[0], -1).astype(jnp.float32)
    wf = weight.astype(jnp.float32)
    x_n = xf / jnp.maximum(jnp.linalg.norm(xf, axis=1, keepdims=True), _EPS)
    w_n = wf / jnp.maximum(jnp.linalg.norm(wf, axis=1, keepdims=True), _EPS)
    return jnp.clip(x_n @ w_n.T, -1.0, 1.0)


if __name__ == "__main__":
    key = jax.random.PRNGKey(0)
    kx1, kw1, kx2, kw2 = jax.random.split(key, 4)

    # Case 1: module-style call -- 4-D input flattened like x.view(B, -1).
    #   x: (2, 4, 16, 16) -> F_in = 1024, F_out = 32.
    x1 = jax.random.normal(kx1, (2, 4, 16, 16), dtype=jnp.float32)
    w1 = init_angular_weight(kw1, 4 * 16 * 16, 32)
    out1 = jax.block_until_ready(angular_linear(x1, w1))
    assert out1.shape == (2, 32)
    assert jnp.allclose(out1, _reference(x1, w1), atol=2e-5), "case 1 mismatch"

    # Case 2: exercises the K grid axis + F_out tiling (grid (1, 3, 4)).
    x2 = jax.random.normal(kx2, (16, 512), dtype=jnp.float32)
    w2 = init_angular_weight(kw2, 512, 384)
    out2 = jax.block_until_ready(
        angular_linear(x2, w2, block_n=128, block_k=128))
    assert out2.shape == (16, 384)
    assert jnp.allclose(out2, _reference(x2, w2), atol=2e-5), "case 2 mismatch"

    # Case 3: bf16 operands stay bf16 on the MXU (f32 accumulation / norms).
    x3 = x1.astype(jnp.bfloat16)
    w3 = w1.astype(jnp.bfloat16)
    out3 = jax.block_until_ready(angular_linear(x3, w3))
    assert out3.shape == (2, 32)
    assert jnp.allclose(out3.astype(jnp.float32), _reference(x3, w3),
                        atol=2e-2), "case 3 mismatch"

    print("KERNEL_OK")
</pallas_src>

<mosaic_0001>
module attributes {stable_mosaic.version = 11 : i64} {
  func.func @_angular_linear_kernel(%arg0: i32, %arg1: i32, %arg2: i32, %arg3: memref<2x1xf32, #tpu.memory_space<vmem>>, %arg4: memref<2x1024xf32, #tpu.memory_space<vmem>>, %arg5: memref<32x1024xf32, #tpu.memory_space<vmem>>, %arg6: memref<2x32xf32, #tpu.memory_space<vmem>>, %arg7: memref<2x32xf32, #tpu.memory_space<vmem>>, %arg8: memref<1x32xf32, #tpu.memory_space<vmem>>) attributes {dimension_semantics = [#tpu.dimension_semantics<parallel>, #tpu.dimension_semantics<parallel>, #tpu.dimension_semantics<arbitrary>], iteration_bounds = array<i64: 1, 1, 1>, scalar_prefetch = 0 : i64, scratch_operands = 2 : i64, tpu.core_type = #tpu.core_type<tc>, window_params = [{transform_indices = @transform_0, window_bounds = array<i64: 2, 1>}, {transform_indices = @transform_1, window_bounds = array<i64: 2, 1024>}, {transform_indices = @transform_2, window_bounds = array<i64: 32, 1024>}, {transform_indices = @transform_3, window_bounds = array<i64: 2, 32>}]} {
    %c0_i32 = arith.constant 0 : i32
    %0 = arith.cmpi eq, %arg2, %c0_i32 : i32
    %1 = arith.extui %0 : i1 to i32
    %c0_i32_0 = arith.constant 0 : i32
    %2 = arith.cmpi ne, %1, %c0_i32_0 : i32
    scf.if %2 {
      %cst_16 = arith.constant 0.000000e+00 : f32
      %18 = vector.broadcast %cst_16 : f32 to vector<2x32xf32>
      %c0_17 = arith.constant 0 : index
      %c0_18 = arith.constant 0 : index
      %19 = vector.load %arg7[%c0_17, %c0_18] : memref<2x32xf32, #tpu.memory_space<vmem>>, vector<2x32xf32>
      tpu.vector_store %arg7[%c0_17, %c0_18], %18 {strides = array<i32>} : memref<2x32xf32, #tpu.memory_space<vmem>>, vector<2x32xf32>,
      %cst_19 = arith.constant 0.000000e+00 : f32
      %20 = vector.broadcast %cst_19 : f32 to vector<1x32xf32>
      %c0_20 = arith.constant 0 : index
      %c0_21 = arith.constant 0 : index
      %21 = vector.load %arg8[%c0_20, %c0_21] : memref<1x32xf32, #tpu.memory_space<vmem>>, vector<1x32xf32>
      tpu.vector_store %arg8[%c0_20, %c0_21], %20 {strides = array<i32>} : memref<1x32xf32, #tpu.memory_space<vmem>>, vector<1x32xf32>,
    } else {
    }
    %c0 = arith.constant 0 : index
    %c0_1 = arith.constant 0 : index
    %3 = vector.load %arg4[%c0, %c0_1] : memref<2x1024xf32, #tpu.memory_space<vmem>>, vector<2x1024xf32>
    %c0_2 = arith.constant 0 : index
    %c0_3 = arith.constant 0 : index
    %4 = vector.load %arg5[%c0_2, %c0_3] : memref<32x1024xf32, #tpu.memory_space<vmem>>, vector<32x1024xf32>
    %c0_4 = arith.constant 0 : index
    %c0_5 = arith.constant 0 : index
    %5 = vector.load %arg7[%c0_4, %c0_5] : memref<2x32xf32, #tpu.memory_space<vmem>>, vector<2x32xf32>
    %cst = arith.constant dense<0.000000e+00> : vector<2x32xf32>
    %6 = tpu.matmul %3, %4, %cst {dimension_numbers = #tpu.dot_dimension_numbers<[1], [1], [0], [0], [0, 0, 1, 0], [], []>} : vector<2x1024xf32>, vector<32x1024xf32>, vector<2x32xf32> -> vector<2x32xf32>
    %7 = arith.addf %5, %6 : vector<2x32xf32>
    %c0_6 = arith.constant 0 : index
    %c0_7 = arith.constant 0 : index
    %8 = vector.load %arg7[%c0_6, %c0_7] : memref<2x32xf32, #tpu.memory_space<vmem>>, vector<2x32xf32>
    tpu.vector_store %arg7[%c0_6, %c0_7], %7 {strides = array<i32>} : memref<2x32xf32, #tpu.memory_space<vmem>>, vector<2x32xf32>,
    %cst_8 = arith.constant 1.000000e+00 : f32
    %9 = vector.broadcast %cst_8 : f32 to vector<1x1024xf32>
    %c0_9 = arith.constant 0 : index
    %c0_10 = arith.constant 0 : index
    %10 = vector.load %arg8[%c0_9, %c0_10] : memref<1x32xf32, #tpu.memory_space<vmem>>, vector<1x32xf32>
    %11 = arith.mulf %4, %4 : vector<32x1024xf32>
    %cst_11 = arith.constant dense<0.000000e+00> : vector<1x32xf32>
    %12 = tpu.matmul %9, %11, %cst_11 {dimension_numbers = #tpu.dot_dimension_numbers<[1], [1], [0], [0], [0, 0, 1, 0], [], []>} : vector<1x1024xf32>, vector<32x1024xf32>, vector<1x32xf32> -> vector<1x32xf32>
    %13 = arith.addf %10, %12 : vector<1x32xf32>
    %c0_12 = arith.constant 0 : index
    %c0_13 = arith.constant 0 : index
    %14 = vector.load %arg8[%c0_12, %c0_13] : memref<1x32xf32, #tpu.memory_space<vmem>>, vector<1x32xf32>
    tpu.vector_store %arg8[%c0_12, %c0_13], %13 {strides = array<i32>} : memref<1x32xf32, #tpu.memory_space<vmem>>, vector<1x32xf32>,
    %c0_i32_14 = arith.constant 0 : i32
    %15 = arith.cmpi eq, %arg2, %c0_i32_14 : i32
    %16 = arith.extui %15 : i1 to i32
    %c0_i32_15 = arith.constant 0 : i32
    %17 = arith.cmpi ne, %16, %c0_i32_15 : i32
    scf.if %17 {
      %c0_16 = arith.constant 0 : index
      %c0_17 = arith.constant 0 : index
      %18 = vector.load %arg8[%c0_16, %c0_17] : memref<1x32xf32, #tpu.memory_space<vmem>>, vector<1x32xf32>
      %cst_18 = arith.constant 1.000000e-24 : f32
      %19 = vector.broadcast %cst_18 : f32 to vector<1x32xf32>
      %20 = arith.maximumf %18, %19 : vector<1x32xf32>
      %21 = math.rsqrt %20 : vector<1x32xf32>
      %c0_19 = arith.constant 0 : index
      %c0_20 = arith.constant 0 : index
      %22 = vector.load %arg7[%c0_19, %c0_20] : memref<2x32xf32, #tpu.memory_space<vmem>>, vector<2x32xf32>
      %c0_21 = arith.constant 0 : index
      %c0_22 = arith.constant 0 : index
      %23 = vector.load %arg3[%c0_21, %c0_22] : memref<2x1xf32, #tpu.memory_space<vmem>>, vector<2x1xf32>
      %24 = vector.broadcast %23 : vector<2x1xf32> to vector<2x32xf32>
      %25 = arith.mulf %22, %24 : vector<2x32xf32>
      %26 = vector.broadcast %21 : vector<1x32xf32> to vector<2x32xf32>
      %27 = arith.mulf %25, %26 : vector<2x32xf32>
      %cst_23 = arith.constant -1.000000e+00 : f32
      %cst_24 = arith.constant 1.000000e+00 : f32
      %28 = vector.broadcast %cst_23 : f32 to vector<2x32xf32>
      %29 = arith.maximumf %28, %27 : vector<2x32xf32>
      %30 = vector.broadcast %cst_24 : f32 to vector<2x32xf32>
      %31 = arith.minimumf %30, %29 : vector<2x32xf32>
      %c0_25 = arith.constant 0 : index
      %c0_26 = arith.constant 0 : index
      %32 = vector.load %arg6[%c0_25, %c0_26] : memref<2x32xf32, #tpu.memory_space<vmem>>, vector<2x32xf32>
      tpu.vector_store %arg6[%c0_25, %c0_26], %31 {strides = array<i32>} : memref<2x32xf32, #tpu.memory_space<vmem>>, vector<2x32xf32>,
    } else {
    }
    return
  }
  func.func @transform_0(%arg0: i32, %arg1: i32, %arg2: i32) -> (i32, i32) {
    %c0_i32 = arith.constant 0 : i32
    %c0_i32_0 = arith.constant 0 : i32
    return %arg0, %c0_i32 : i32, i32
  }
  func.func @transform_1(%arg0: i32, %arg1: i32, %arg2: i32) -> (i32, i32) {
    %c0_i32 = arith.constant 0 : i32
    return %arg0, %arg2 : i32, i32
  }
  func.func @transform_2(%arg0: i32, %arg1: i32, %arg2: i32) -> (i32, i32) {
    %c0_i32 = arith.constant 0 : i32
    return %arg1, %arg2 : i32, i32
  }
  func.func @transform_3(%arg0: i32, %arg1: i32, %arg2: i32) -> (i32, i32) {
    %c0_i32 = arith.constant 0 : i32
    return %arg0, %arg1 : i32, i32
  }
}

</mosaic_0001>

<bundles_post_ra>
// kernel: tpu_custom_call.1
= control target key start
LH: loop header
LB: loop body
LE: loop exit
PB: predicated region body
PF: predicated region fallthrough
CT: control target
= control target key end

     0   :  { %8 = vsyncpa [#allocation5], 0  ;;  %s1162_s0 = inlined_call_operand.vmem [shape: f32[2,1], index: 0, kind: input, shape index: {}]   ;;  %s1163_s1 = inlined_call_operand.hbm [shape: f32[2,1024], index: 1, kind: input, shape index: {}]   ;;  %s1164_s2 = inlined_call_operand.hbm [shape: f32[32,1024], index: 2, kind: input, shape index: {}]   ;;  %s1165_s3 = inlined_call_operand.hbm [shape: f32[2,32], index: 3, kind: output, shape index: {}]  }
   0x1   :  { %9 = vsyncpa [#allocation8], 0 }
   0x2   :  { %10 = vsyncpa [#allocation6], 0  ;;  %s918_s12 = smov [#allocation4]   ;;  %s919_s14 = smov [#allocation7]  }
   0x3   :  { %s19_s13 = sshll.u32 %s918_s12, 4  ;;  %s28_s15 = sshll.u32 %s919_s14, 4  ;;  %s20_s13 = int_to_ptr.vmem [resolvable:$true] %s19_s13  ;;  %s947_s15 = int_to_ptr.vmem [resolvable:$true] %s28_s15 }
   0x4   :  { %s846_s18 = scalar_lea.hbm %s1163_s1, 256 }
   0x5   :  { %p847_p0 = scmp.ne.s32.totalorder %s1163_s1, %s846_s18  ;;  %p850_p1 = scmp.lt.u32.totalorder %s846_s18, %s1163_s1 }
   0x7   :  { %p852_p2 = pnand %p850_p1, %p847_p0 }
   0x9   :  { %855 = shalt.err (!%p852_p2)
}
   0xa   :  { %s856_s23 = scalar_lea.vmem %s20_s13, 256  ;;  %p861_p4 = scmp.lt.s32.totalorder %s20_s13, %s20_s13 }
   0xb   :  { %p857_p3 = scmp.ne.s32.totalorder %s20_s13, %s856_s23  ;;  %p862_p5 = scmp.lt.s32.totalorder %s856_s23, %s856_s23 }
   0xd   :  { %p863_p6 = por %p862_p5, %p861_p4 }
   0xf   :  { %p864_p7 = pnand %p863_p6, %p857_p3 }
  0x11   :  { %867 = shalt.err (!%p864_p7)
}
  0x12   :  { %22 = dma.hbm_to_vmem [thread:$0]  %s1163_s1, 256, %s20_s13, [#allocation5]  }
  0x13   :  { %s868_s28 = scalar_lea.hbm %s1164_s2, 4096 }
  0x14   :  { %p869_p8 = scmp.ne.s32.totalorder %s1164_s2, %s868_s28  ;;  %p872_p9 = scmp.lt.u32.totalorder %s868_s28, %s1164_s2 }
  0x16   :  { %p874_p10 = pnand %p872_p9, %p869_p8 }
  0x18   :  { %877 = shalt.err (!%p874_p10)
}
  0x19   :  { %s878_s6 = scalar_lea.vmem %s947_s15, 4096  ;;  %p883_p12 = scmp.lt.s32.totalorder %s947_s15, %s947_s15 }
  0x1a   :  { %p879_p11 = scmp.ne.s32.totalorder %s947_s15, %s878_s6  ;;  %p884_p13 = scmp.lt.s32.totalorder %s878_s6, %s878_s6 }
  0x1c   :  { %p885_p0 = por %p884_p13, %p883_p12 }
  0x1e   :  { %p886_p1 = pnand %p885_p0, %p879_p11 }
  0x20   :  { %889 = shalt.err (!%p886_p1)
}
  0x21   :  { %s920_s1 = smov 1024   ;;  %s921_s7 = smov 64  }
  0x22   :  { %34 = dma.hbm_to_vmem [thread:$0]  %s1164_s2, 4096, %s947_s15, [#allocation8], %s920_s1, %s920_s1, %s921_s7  }
  0x23   :  { %912 = dma.done.wait [#allocation5], 256  }
  0x24   :  { %913 = vsyncadd [#allocation5], 4294967040 }
  0x25   :  { %914 = dma.done.wait [#allocation8], 4096  }
  0x26   :  { %915 = vsyncadd [#allocation8], 4294963200  ;;  %v922_v0 = vmov 1983009808   ;;  %v90_v2 = vlaneseq  ;;  %v923_v3 = vmov 0   ;;  %v980_v6 = vld [vmem:[#allocation7 + $0x8] sm:$0xff] }
  0x27   :  { %v88_v1 = vunpack.c.l.s4 %v922_v0  ;;  %841 = vset.pattern.permute.xlu0 %v923_v3  ;;  %v982_v7 = vld [vmem:[#allocation7 + $0x48] sm:$0xff]  ;;  %v984_v8 = vld [vmem:[#allocation7] sm:$0xff]  ;;  %v990_v11 = vld [vmem:[#allocation7 + $0x18] sm:$0xff]  ;;  %v413_v62 = vmul.f32 %v980_v6, %v980_v6  ;;  %vm45_vm0 = vcmask 254976   ;;  %vm47_vm1 = vcmask 253952  }
  0x28   :  { %v978_v5 = vshrl.u32 %v90_v2, 7  ;;  %v768_v9 = vpack.c.bf16 %v982_v7, %v980_v6  ;;  %v988_v10 = vld [vmem:[#allocation7 + $0x40] sm:$0xff]  ;;  %v992_v12 = vld [vmem:[#allocation7 + $0x58] sm:$0xff]  ;;  %v998_v15 = vld [vmem:[#allocation7 + $0x10] sm:$0xff]  ;;  %v421_v63 = vmul.f32 %v982_v7, %v982_v7  ;;  %v415_v2 = vmul.f32 %v990_v11, %v990_v11 }
  0x29   :  { %v89_v4 = vunpack.c.0.s8 %v88_v1  ;;  %v770_v13 = vpack.c.bf16 %v988_v10, %v984_v8  ;;  %v776_v14 = vpack.c.bf16 %v992_v12, %v990_v11  ;;  %v1000_v16 = vld [vmem:[#allocation7 + $0x50] sm:$0xff]  ;;  %v1002_v17 = vld [vmem:[#allocation7 + $0x88] sm:$0xff]  ;;  %v1011_v22 = vld [vmem:[#allocation7 + $0x98] sm:$0xff]  ;;  %v423_v3 = vmul.f32 %v992_v12, %v992_v12 }
  0x2a   :  { %769 = vmatprep.subr.bf16.mxu0 %v768_v9  ;;  %v778_v19 = vpack.c.bf16 %v1000_v16, %v998_v15  ;;  %v1007_v20 = vld [vmem:[#allocation7 + $0xc8] sm:$0xff]  ;;  %v1013_v23 = vld [vmem:[#allocation7 + $0xd8] sm:$0xff]  ;;  %v1015_v24 = vld [vmem:[#allocation7 + $0x80] sm:$0xff]  ;;  %v412_v11 = vmul.f32 %v984_v8, %v984_v8  ;;  %v420_v12 = vmul.f32 %v988_v10, %v988_v10  ;;  %v431_v8 = vmul.f32 %v1011_v22, %v1011_v22 }
  0x2b   :  { %v92_v18 = vsub.s32 %v89_v4, %v978_v5  ;;  %771 = vmatpush1.bf16.xpose.msra.mxu0 %v770_v13  ;;  %777 = vmatprep.subr.bf16.mxu1 %v776_v14  ;;  %v772_v21 = vpack.c.bf16 %v1007_v20, %v1002_v17  ;;  %v1017_v25 = vld [vmem:[#allocation7 + $0xc0] sm:$0xff]  ;;  %v780_v26 = vpack.c.bf16 %v1013_v23, %v1011_v22  ;;  %v49_v27 = vld [vmem:[#allocation4] sm:$0xff]  ;;  %v1025_v31 = vld [vmem:[#allocation7 + $0x28] sm:$0xff] }
  0x2c   :  { %779 = vmatpush1.bf16.xpose.msra.mxu1 %v778_v19  ;;  %v1021_v28 = vld [vmem:[#allocation7 + $0x90] sm:$0xff]  ;;  %v86_v32 = vcombine.high %v49_v27, %v49_v27  ;;  %v1027_v33 = vld [vmem:[#allocation7 + $0x68] sm:$0xff]  ;;  %v1029_v34 = vld [vmem:[#allocation7 + $0x38] sm:$0xff]  ;;  %v774_v36 = vpack.c.bf16 %v1017_v25, %v1015_v24  ;;  %v800_v13 = vpack.c.bf16 %v421_v63, %v413_v62  ;;  %v808_v14 = vpack.c.bf16 %v423_v3, %v415_v2 }
  0x2d   :  { %773 = vmatprep.subr.bf16.mxu0 %v772_v21  ;;  %v1023_v29 = vld [vmem:[#allocation7 + $0xd0] sm:$0xff]  ;;  %v93_v30 = vrot.slane %v49_v27, %v92_v18  ;;  %781 = vmatprep.subr.bf16.mxu1 %v780_v26  ;;  %v1031_v35 = vld [vmem:[#allocation7 + $0x78] sm:$0xff]  ;;  %v784_v40 = vpack.c.bf16 %v1027_v33, %v1025_v31  ;;  %v734_v45 = vld [vmem:[%s1162_s0] sm:$0x3]  ;;  %v422_v19 = vmul.f32 %v1000_v16, %v1000_v16  ;;  %s926_s0 = smov [#allocation9]  }
  0x2e   :  { %v782_v38 = vpack.c.bf16 %v1023_v29, %v1021_v28  ;;  %v100_v39 = vrot.slane %v86_v32, %v92_v18  ;;  %v792_v41 = vpack.c.bf16 %v1031_v35, %v1029_v34  ;;  %v50_v43 = vld [vmem:[#allocation4 + $0x8] sm:$0xff]  ;;  %v1044_v46 = vld [vmem:[#allocation7 + $0x20] sm:$0xff]  ;;  %v1048_v48 = vld [vmem:[#allocation7 + $0x30] sm:$0xff]  ;;  %737 = vperm.xlu0 %841, %v734_v45   ;;  %v429_v21 = vmul.f32 %v1002_v17, %v1002_v17  ;;  %s757_s11 = sshll.u32 %s926_s0, 4  ;;  %s758_s11 = int_to_ptr.vmem [resolvable:$true] %s757_s11 }
  0x2f   :  { %v101_v37 = vcombine.high %v93_v30, %v93_v30  ;;  %v103_v44 = vcombine.high %v50_v43, %v50_v43  ;;  %v1046_v47 = vld [vmem:[#allocation7 + $0x60] sm:$0xff]  ;;  %v1050_v49 = vld [vmem:[#allocation7 + $0x70] sm:$0xff]  ;;  %v1052_v50 = vld [vmem:[#allocation7 + $0xa8] sm:$0xff]  ;;  %v110_v52 = vrot.slane %v50_v43, %v92_v18  ;;  %v437_v26 = vmul.f32 %v1007_v20, %v1007_v20  ;;  %s890_s12 = scalar_lea.vmem %s758_s11, 32  ;;  %p895_p3 = scmp.lt.s32.totalorder %s758_s11, %s758_s11 }
  0x30   :  { %v102_v42 = vcombine.high %v100_v39, %v100_v39  ;;  %v1054_v51 = vld [vmem:[#allocation7 + $0xe8] sm:$0xff]  ;;  %v1056_v53 = vld [vmem:[#allocation7 + $0xb8] sm:$0xff]  ;;  %v786_v56 = vpack.c.bf16 %v1046_v47, %v1044_v46  ;;  %v794_v57 = vpack.c.bf16 %v1050_v49, %v1048_v48  ;;  %v1072_v0 = vld [vmem:[#allocation7 + $0xa0] sm:$0xff]  ;;  %v439_v10 = vmul.f32 %v1013_v23, %v1013_v23  ;;  %p891_p2 = scmp.ne.s32.totalorder %s758_s11, %s890_s12  ;;  %p896_p4 = scmp.lt.s32.totalorder %s890_s12, %s890_s12 }
  0x31   :  { %192 = vmatprep.mubr.f32.mxu0 %v101_v37  ;;  %v1058_v54 = vld [vmem:[#allocation7 + $0xf8] sm:$0xff]  ;;  %v117_v55 = vrot.slane %v103_v44, %v92_v18  ;;  %v788_v58 = vpack.c.bf16 %v1054_v51, %v1052_v50  ;;  %v118_v60 = vcombine.high %v110_v52, %v110_v52  ;;  %v1074_v1 = vld [vmem:[#allocation7 + $0xe0] sm:$0xff]  ;;  %v1080_v4 = vld [vmem:[#allocation7 + $0xb0] sm:$0xff]  ;;  %v414_v18 = vmul.f32 %v998_v15, %v998_v15 }
  0x32   :  { %262 = vmatprep.mubr.f32.mxu1 %v102_v42  ;;  %v796_v59 = vpack.c.bf16 %v1058_v54, %v1056_v53  ;;  %v1082_v9 = vld [vmem:[#allocation7 + $0xf0] sm:$0xff]  ;;  %v790_v6 = vpack.c.bf16 %v1074_v1, %v1072_v0  ;;  %v802_v15 = vpack.c.bf16 %v420_v12, %v412_v11  ;;  %v812_v32 = vpack.c.bf16 %v439_v10, %v431_v8  ;;  %p897_p5 = por %p896_p4, %p895_p3 }
  0x33   :  { %775 = vmatpush1.bf16.xpose.msra.mxu0 %v774_v36  ;;  %v119_v61 = vcombine.high %v117_v55, %v117_v55  ;;  %v798_v7 = vpack.c.bf16 %v1082_v9, %v1080_v4  ;;  %v810_v27 = vpack.c.bf16 %v422_v19, %v414_v18  ;;  %v428_v16 = vmul.f32 %v1015_v24, %v1015_v24 }
  0x34   :  { %783 = vmatpush1.bf16.xpose.msra.mxu1 %v782_v38  ;;  %785 = vmatprep.subr.bf16.mxu0 %v784_v40  ;;  %v436_v17 = vmul.f32 %v1017_v25, %v1017_v25  ;;  %v430_v20 = vmul.f32 %v1021_v28, %v1021_v28  ;;  %v438_v22 = vmul.f32 %v1023_v29, %v1023_v29  ;;  %v924_v24 = vmov 1.0   ;;  %p898_p6 = pnand %p897_p5, %p891_p2 }
  0x35   :  { %793 = vmatprep.subr.bf16.mxu1 %v792_v41  ;;  %v417_v23 = vmul.f32 %v1025_v31, %v1025_v31  ;;  %v425_v36 = vmul.f32 %v1027_v33, %v1027_v33  ;;  %v419_v25 = vmul.f32 %v1029_v34, %v1029_v34  ;;  %v427_v28 = vmul.f32 %v1031_v35, %v1031_v35 }
  0x36   :  { %v806_v37 = vpack.c.bf16 %v436_v17, %v428_v16  ;;  %v814_v29 = vpack.c.bf16 %v438_v22, %v430_v20  ;;  %v416_v31 = vmul.f32 %v1044_v46, %v1044_v46  ;;  %v424_v33 = vmul.f32 %v1046_v47, %v1046_v47 }
  0x37   :  { %v816_v38 = vpack.c.bf16 %v425_v36, %v417_v23  ;;  %v418_v40 = vmul.f32 %v1048_v48, %v1048_v48  ;;  %v426_v34 = vmul.f32 %v1050_v49, %v1050_v49  ;;  %v433_v35 = vmul.f32 %v1052_v50, %v1052_v50 }
  0x38   :  { %v441_v41 = vmul.f32 %v1054_v51, %v1054_v51  ;;  %v435_v42 = vmul.f32 %v1056_v53, %v1056_v53  ;;  %v443_v43 = vmul.f32 %v1058_v54, %v1058_v54  ;;  %v818_v44 = vpack.c.bf16 %v424_v33, %v416_v31 }
  0x39   :  { %v826_v45 = vpack.c.bf16 %v426_v34, %v418_v40  ;;  %v432_v48 = vmul.f32 %v1072_v0, %v1072_v0  ;;  %v440_v49 = vmul.f32 %v1074_v1, %v1074_v1  ;;  %v434_v50 = vmul.f32 %v1080_v4, %v1080_v4 }
  0x3a   :  { %193 = vmatmul.mubr.f32.vlgmr.msra.gmra.mrb[0].mxu0 %v93_v30  ;;  %v804_v30 = vpack.c.bf16 %v437_v26, %v429_v21  ;;  %v820_v46 = vpack.c.bf16 %v441_v41, %v433_v35  ;;  %v828_v47 = vpack.c.bf16 %v443_v43, %v435_v42  ;;  %v442_v51 = vmul.f32 %v1082_v9, %v1082_v9 }
  0x3b   :  { %263 = vmatmul.mubr.f32.vlgmr.msra.gmra.mrb[0].mxu1 %v100_v39  ;;  %787 = vmatpush1.bf16.xpose.msra.mxu0 %v786_v56  ;;  %v824_v39 = vpack.c.bf16 %v427_v28, %v419_v25  ;;  %v925_v54 = vmov 0.0  }
  0x3c   :  { %795 = vmatpush1.bf16.xpose.msra.mxu1 %v794_v57  ;;  %789 = vmatprep.subr.bf16.mxu0 %v788_v58  ;;  %v830_v53 = vpack.c.bf16 %v442_v51, %v434_v50  ;;  %46 = vst.msk [vmem:[#allocation2] sm:$0x3] %vm45_vm0, %v925_v54 }
  0x3d   :  { %797 = vmatprep.subr.bf16.mxu1 %v796_v59  ;;  %332 = vmatprep.mubr.f32.mxu0 %v118_v60  ;;  %48 = vst.msk [vmem:[#allocation3] sm:$0x1] %vm47_vm1, %v925_v54 }
  0x3e   :  { %402 = vmatprep.mubr.f32.mxu1 %v119_v61 }
  0x43   :  { %791 = vmatpush1.bf16.xpose.msra.mxu0 %v790_v6  ;;  %v83_v0 = vld [vmem:[#allocation2] sm:$0x3] }
  0x44   :  { %799 = vmatpush1.bf16.xpose.msra.mxu1 %v798_v7  ;;  %801 = vmatprep.subr.bf16.mxu0 %v800_v13  ;;  %v411_v19 = vld [vmem:[#allocation3] sm:$0x1] }
  0x45   :  { %809 = vmatprep.subr.bf16.mxu1 %v808_v14 }
  0x4a   :  { %333 = vmatmul.mubr.f32.vlgmr.msra.gmra.mrb[2].mxu0 %v110_v52  ;;  %v822_v52 = vpack.c.bf16 %v440_v49, %v432_v48 }
  0x4b   :  { %803 = vmatpush1.bf16.xpose.msra.mxu0 %v802_v15  ;;  %403 = vmatmul.mubr.f32.vlgmr.msra.gmra.mrb[2].mxu1 %v117_v55 }
  0x4c   :  { %811 = vmatpush1.bf16.xpose.msra.mxu1 %v810_v27  ;;  %805 = vmatprep.subr.bf16.mxu0 %v804_v30  ;;  %v744_v27 = vsub.s32 0, %v978_v5 }
  0x4d   :  { %813 = vmatprep.subr.bf16.mxu1 %v812_v32  ;;  %508 = vmatprep.mubr.f32.mxu0 %v924_v24 }
  0x4e   :  { %578 = vmatprep.mubr.f32.mxu1 %v924_v24 }
  0x53   :  { %807 = vmatpush1.bf16.xpose.msra.mxu0 %v806_v37 }
  0x54   :  { %815 = vmatpush1.bf16.xpose.msra.mxu1 %v814_v29  ;;  %817 = vmatprep.subr.bf16.mxu0 %v816_v38 }
  0x55   :  { %825 = vmatprep.subr.bf16.mxu1 %v824_v39 }
  0x5a   :  { %509 = vmatmul.mubr.f32.vlgmr.msra.gmra.mrb[4].mxu0 %v924_v24 }
  0x5b   :  { %579 = vmatmul.mubr.f32.vlgmr.msra.gmra.mrb[4].mxu1 %v924_v24  ;;  %819 = vmatpush1.bf16.xpose.msra.mxu0 %v818_v44 }
  0x5c   :  { %827 = vmatpush1.bf16.xpose.msra.mxu1 %v826_v45  ;;  %821 = vmatprep.subr.bf16.mxu0 %v820_v46 }
  0x5d   :  { %829 = vmatprep.subr.bf16.mxu1 %v828_v47  ;;  %648 = vmatprep.mubr.f32.mxu0 %v924_v24 }
  0x5e   :  { %718 = vmatprep.mubr.f32.mxu1 %v924_v24 }
  0x63   :  { %823 = vmatpush1.bf16.xpose.msra.mxu0 %v822_v52 }
  0x64   :  { %831 = vmatpush1.bf16.xpose.msra.mxu1 %v830_v53 }
  0x6a   :  { %649 = vmatmul.mubr.f32.vlgmr.msra.gmra.mrb[6].mxu0 %v924_v24 }
  0x6b   :  { %719 = vmatmul.mubr.f32.vlgmr.msra.gmra.mrb[6].mxu1 %v924_v24 }
  0xad   :  { %v738_v30 = vpop.permute.xlu0 %737 }
 0x10d   :  { %v194_v55 = vpop.f32.mrb[0].mxu0 }
 0x10e   :  { %v196_v56 = vpop.f32.mrb[1].mxu0  ;;  %v264_v57 = vpop.f32.mrb[0].mxu1 }
 0x10f   :  { %v265_v58 = vadd.f32 %v264_v57, %v194_v55  ;;  %v266_v59 = vpop.f32.mrb[1].mxu1 }
 0x11d   :  { %v334_v60 = vpop.f32.mrb[2].mxu0 }
 0x11e   :  { %v335_v61 = vadd.f32 %v334_v60, %v265_v58  ;;  %v336_v62 = vpop.f32.mrb[3].mxu0  ;;  %v404_v63 = vpop.f32.mrb[2].mxu1 }
 0x11f   :  { %v406_v1 = vpop.f32.mrb[3].mxu1 }
 0x120   :  { %v405_v2 = vadd.f32 %v404_v63, %v335_v61 }
 0x122   :  { %v408_v3 = vadd.f32 %v405_v2, %v83_v0 }
 0x124   :  { %410 = vst.msk [vmem:[#allocation2] sm:$0x3] %vm45_vm0, %v408_v3 }
 0x12b   :  { %v733_v32 = vld [vmem:[#allocation2] sm:$0x3] }
 0x12c   :  { %v740_v17 = vmul.f32 %v738_v30, %v733_v32 }
 0x12d   :  { %v510_v4 = vpop.f32.mrb[4].mxu0 }
 0x12e   :  { %v512_v9 = vpop.f32.mrb[5].mxu0  ;;  %v580_v6 = vpop.f32.mrb[4].mxu1 }
 0x12f   :  { %v581_v7 = vadd.f32 %v580_v6, %v510_v4  ;;  %v582_v13 = vpop.f32.mrb[5].mxu1 }
 0x13d   :  { %v650_v14 = vpop.f32.mrb[6].mxu0 }
 0x13e   :  { %v651_v11 = vadd.f32 %v650_v14, %v581_v7  ;;  %v652_v12 = vpop.f32.mrb[7].mxu0  ;;  %v720_v18 = vpop.f32.mrb[6].mxu1 }
 0x13f   :  { %v722_v21 = vpop.f32.mrb[7].mxu1 }
 0x140   :  { %v721_v26 = vadd.f32 %v720_v18, %v651_v11 }
 0x142   :  { %v724_v8 = vadd.f32 %v721_v26, %v411_v19 }
 0x144   :  { %726 = vst.msk [vmem:[#allocation3] sm:$0x1] %vm47_vm1, %v724_v8 }
 0x14b   :  { %v730_v10 = vld [vmem:[#allocation3] sm:$0x1] }
 0x14c   :  { %v731_v15 = vmax.f32 %v730_v10, 1e-24 }
 0x14e   :  { %844 = vrsqrt.f32 %v731_v15 }
 0x158   :  { %v845_v16 = vpop.eup %844 }
 0x159   :  { %v745_v20 = vrot.slane %v845_v16, %v744_v27 }
 0x15b   :  { %v747_v22 = vmul.f32 %v745_v20, %v740_v17 }
 0x15d   :  { %v767_v23 = vclamps-f32 %v747_v22, 1.0 }
 0x15f   :  { %750 = vst.msk [vmem:[#allocation9] sm:$0x3] %vm45_vm0, %v767_v23 }
 0x160   :  { %901 = shalt.err (!%p898_p6)
}
 0x161   :  { %s902_s15 = scalar_lea.hbm %s1165_s3, 32 }
 0x162   :  { %p903_p7 = scmp.ne.s32.totalorder %s1165_s3, %s902_s15  ;;  %p906_p8 = scmp.lt.u32.totalorder %s902_s15, %s1165_s3 }
 0x164   :  { %p908_p9 = pnand %p906_p8, %p903_p7 }
 0x166   :  { %911 = shalt.err (!%p908_p9)
}
 0x167   :  { %760 = dma.vmem_to_hbm [thread:$0]  %s758_s11, 32, %s1165_s3, [#allocation6]  }
 0x168   :  { %916 = dma.done.wait [#allocation6], 32  }
 0x169   :  { %917 = vsyncadd [#allocation6], 4294967264 }
 0x16a   :  { %764 = vsyncpa [#allocation5], 1 }
 0x16b   :  { %765 = vsyncpa [#allocation8], 1 }
 0x16c   :  { %766 = vsyncpa [#allocation6], 1 }

</bundles_post_ra>
